<compile_context>
chip_gen: v5e
topology: v5e:2x2
jax: 0.10.0
libtpu: 0.0.40
codegen_flags: <defaults>
</compile_context>

<pallas_src>
import functools
import math

import jax
import jax.numpy as jnp
import numpy as np
from jax.experimental import pallas as pl
from jax.experimental.pallas import tpu as pltpu


def _layer_norm(x, gamma, beta, eps=1e-5):
    mean = jnp.mean(x, axis=-1, keepdims=True)
    var = jnp.mean((x - mean) ** 2, axis=-1, keepdims=True)
    return (x - mean) * jax.lax.rsqrt(var + eps) * gamma + beta


def encoder_block_kernel(
    x_ref,             # (Bt, S, H) f32
    vl_ref,            # (Bt, 1, 1) int32 valid lens
    wqkv_ref,          # (H, 3H) bf16  (scale folded into the Wq slice)
    wo_ref,            # (H, H)  bf16
    g1_ref, b1n_ref,   # (1, H) f32  LayerNorm1 weight / bias
    w1_ref, bf1_ref,   # (H, F) bf16, (1, F) f32   FFN dense1
    w2_ref, bf2_ref,   # (F, H) bf16, (1, H) f32   FFN dense2
    g2_ref, b2n_ref,   # (1, H) f32  LayerNorm2 weight / bias
    o_ref,             # (Bt, S, H) f32
    *, num_heads,
):
    Bt, S, H = x_ref.shape
    dh = H // num_heads

    x = x_ref[...].reshape(Bt * S, H)                       # (Bt*S, H) f32
    x_bf = x.astype(jnp.bfloat16)

    # Fused QKV projection: one (Bt*S, H) @ (H, 3H) MXU pass, f32 accumulate.
    qkv = jnp.dot(x_bf, wqkv_ref[...], preferred_element_type=jnp.float32)
    q3 = qkv[:, 0 * H:1 * H].reshape(Bt, S, H)              # scale already folded in
    k3 = qkv[:, 1 * H:2 * H].reshape(Bt, S, H)
    v3 = qkv[:, 2 * H:3 * H].astype(jnp.bfloat16).reshape(Bt, S, H)

    # valid_lens mask on the key axis only: (Bt, 1, S), broadcast over queries.
    vl = vl_ref[...]                                        # (Bt, 1, 1) int32
    key_idx = jax.lax.broadcasted_iota(jnp.int32, (Bt, 1, S), 2)
    keep = key_idx < vl                                     # (Bt, 1, S) bool

    # Per-head attention (bf16 MXU inputs, f32 softmax); heads are
    # lane-concatenated and projected with ONE full-depth Wo matmul.
    heads = []
    for h in range(num_heads):
        lo, hi = h * dh, (h + 1) * dh
        qh = q3[:, :, lo:hi].astype(jnp.bfloat16)           # (Bt, S, dh)
        kh = k3[:, :, lo:hi].astype(jnp.bfloat16)
        vh = v3[:, :, lo:hi]                                # bf16
        s = jnp.einsum("bqd,bkd->bqk", qh, kh,
                       preferred_element_type=jnp.float32)  # (Bt, S, S) f32
        s = jnp.where(keep, s, -1e6)                        # d2l masked_softmax
        s = s - jnp.max(s, axis=-1, keepdims=True)
        p = jnp.exp(s)
        p = p * pl.reciprocal(jnp.sum(p, axis=-1, keepdims=True), approx=True)
        ah = jnp.einsum("bqk,bkd->bqd", p.astype(jnp.bfloat16), vh,
                        preferred_element_type=jnp.float32)  # (Bt, S, dh) f32
        heads.append(ah)

    attn = jnp.concatenate(heads, axis=-1).reshape(Bt * S, H)
    attn_proj = jnp.dot(attn.astype(jnp.bfloat16), wo_ref[...],
                        preferred_element_type=jnp.float32)  # (Bt*S, H) f32

    # AddNorm 1 (dropout = identity in eval), f32 elementwise.
    y = _layer_norm(x + attn_proj, g1_ref[...], b1n_ref[...])

    # PositionWiseFFN: relu(Y @ W1 + b1) @ W2 + b2, bf16 MXU / f32 accumulate.
    hdn = jnp.maximum(
        jnp.dot(y.astype(jnp.bfloat16), w1_ref[...],
                preferred_element_type=jnp.float32) + bf1_ref[...],
        0.0)
    ffn = jnp.dot(hdn.astype(jnp.bfloat16), w2_ref[...],
                  preferred_element_type=jnp.float32) + bf2_ref[...]

    # AddNorm 2.
    out = _layer_norm(y + ffn, g2_ref[...], b2n_ref[...])
    o_ref[...] = out.reshape(Bt, S, H).astype(o_ref.dtype)


def encoder_block(x, valid_lens, params, *, num_heads, block_b=None):
    B, S, H = x.shape
    F = params["w1"].shape[1]
    dh = H // num_heads
    scale = 1.0 / math.sqrt(dh)

    # Batch rows per grid step.  Prefer >= 2 grid programs (two TensorCores on
    # v7x shard the "parallel" axis); cap rows per step for VMEM.
    if block_b is None:
        divisors = [d for d in range(1, min(B, 8) + 1) if B % d == 0]
        multi = [d for d in divisors if B // d >= 2]
        block_b = max(multi) if multi else max(divisors)
    assert B % block_b == 0, "batch must be divisible by block_b"
    grid = (B // block_b,)

    vl = valid_lens.reshape(B, 1, 1).astype(jnp.int32)

    # Host-side parameter prep:
    #  * fold 1/sqrt(dh) into Wq,
    #  * fuse Wq|Wk|Wv into one (H, 3H) weight,
    #  * cast all matmul weights to bf16 (LayerNorm params / biases stay f32).
    wqkv = jnp.concatenate(
        [params["wq"] * scale, params["wk"], params["wv"]], axis=1
    ).astype(jnp.bfloat16)
    wo = params["wo"].astype(jnp.bfloat16)
    w1 = params["w1"].astype(jnp.bfloat16)
    w2 = params["w2"].astype(jnp.bfloat16)

    # Weights/biases: fully VMEM-resident, single copy (no double-buffering).
    wspec = pl.BlockSpec(memory_space=pltpu.MemorySpace.VMEM)

    # Scoped-VMEM estimate (conservative), generation-aware cap.
    weight_bytes = 2 * (3 * H * H + H * H + H * F + F * H) + 4 * (7 * H + F)
    act_bytes = 4 * block_b * S * (10 * H + 2 * F) + 4 * block_b * S * S * 3
    io_bytes = 2 * 2 * 4 * block_b * S * H          # double-buffered X / out blocks
    need = int(1.5 * (weight_bytes + act_bytes + io_bytes))
    vmem_limit = None
    if need > 12 * (1 << 20):
        try:
            cap = int(0.85 * pltpu.get_tpu_info().vmem_capacity_bytes)
        except Exception:
            cap = 56 * (1 << 20)                    # safe for v7x's 64 MiB/TC
        vmem_limit = min(need, cap)

    # Advisory cost estimate so XLA schedules neighbours around the kernel.
    flops = 2 * B * S * (3 * H * H + H * H + 2 * H * F) + 4 * B * S * S * H
    transcendentals = B * num_heads * S * S + 2 * B * S
    bytes_accessed = (8 * B * S * H                       # X in + out (f32)
                      + 2 * (4 * H * H + 2 * H * F)        # bf16 weights
                      + 4 * (7 * H + F) + 4 * B)
    cost = pl.CostEstimate(flops=flops, transcendentals=transcendentals,
                           bytes_accessed=bytes_accessed)

    kernel = functools.partial(encoder_block_kernel, num_heads=num_heads)
    return pl.pallas_call(
        kernel,
        out_shape=jax.ShapeDtypeStruct((B, S, H), jnp.float32),
        grid=grid,
        in_specs=[
            pl.BlockSpec((block_b, S, H), lambda i: (i, 0, 0)),   # X
            pl.BlockSpec((block_b, 1, 1), lambda i: (i, 0, 0)),   # valid_lens
            wspec, wspec,                    # Wqkv, Wo
            wspec, wspec,                    # LN1 gamma / beta
            wspec, wspec,                    # FFN dense1 W / b
            wspec, wspec,                    # FFN dense2 W / b
            wspec, wspec,                    # LN2 gamma / beta
        ],
        out_specs=pl.BlockSpec((block_b, S, H), lambda i: (i, 0, 0)),
        compiler_params=pltpu.CompilerParams(
            dimension_semantics=("parallel",),
            vmem_limit_bytes=vmem_limit,
        ),
        cost_estimate=cost,
    )(
        x, vl,
        wqkv, wo,
        params["ln1_g"], params["ln1_b"],
        w1, params["b1"],
        w2, params["b2"],
        params["ln2_g"], params["ln2_b"],
    )


def encoder_block_ref(x, valid_lens, params, *, num_heads):
    """Pure-JAX f32 reference mirroring the PyTorch module (eval mode)."""
    B, S, H = x.shape
    dh = H // num_heads
    q = x @ params["wq"]
    k = x @ params["wk"]
    v = x @ params["wv"]

    def split(t):  # (B,S,H) -> (B,heads,S,dh)
        return t.reshape(B, S, num_heads, dh).transpose(0, 2, 1, 3)

    qh, kh, vh = split(q), split(k), split(v)
    scores = jnp.einsum("bhqd,bhkd->bhqk", qh, kh) / math.sqrt(dh)
    key_idx = jnp.arange(S)
    mask = key_idx[None, None, None, :] < valid_lens[:, None, None, None]
    scores = jnp.where(mask, scores, -1e6)
    p = jax.nn.softmax(scores, axis=-1)
    attn = jnp.einsum("bhqk,bhkd->bhqd", p, vh).transpose(0, 2, 1, 3).reshape(B, S, H)
    attn = attn @ params["wo"]
    y = _layer_norm(x + attn, params["ln1_g"][0], params["ln1_b"][0])
    ffn = jnp.maximum(y @ params["w1"] + params["b1"][0], 0.0) @ params["w2"] + params["b2"][0]
    return _layer_norm(y + ffn, params["ln2_g"][0], params["ln2_b"][0])


if __name__ == "__main__":
    B, S, H, F, NH = 2, 8, 32, 64, 4   # batch, seq, num_hiddens, ffn_num_hiddens, heads

    key = jax.random.PRNGKey(0)
    ks = jax.random.split(key, 10)
    scale = 0.1
    params = {
        "wq": scale * jax.random.normal(ks[0], (H, H), jnp.float32),
        "wk": scale * jax.random.normal(ks[1], (H, H), jnp.float32),
        "wv": scale * jax.random.normal(ks[2], (H, H), jnp.float32),
        "wo": scale * jax.random.normal(ks[3], (H, H), jnp.float32),
        "ln1_g": jnp.ones((1, H), jnp.float32),
        "ln1_b": jnp.zeros((1, H), jnp.float32),
        "w1": scale * jax.random.normal(ks[4], (H, F), jnp.float32),
        "b1": scale * jax.random.normal(ks[5], (1, F), jnp.float32),
        "w2": scale * jax.random.normal(ks[6], (F, H), jnp.float32),
        "b2": scale * jax.random.normal(ks[7], (1, H), jnp.float32),
        "ln2_g": jnp.ones((1, H), jnp.float32),
        "ln2_b": jnp.zeros((1, H), jnp.float32),
    }

    x = jax.random.normal(ks[8], (B, S, H), jnp.float32)
    valid_lens = jnp.array([5, 8], dtype=jnp.int32)   # per-batch valid key lengths

    out = encoder_block(x, valid_lens, params, num_heads=NH)
    out = jax.block_until_ready(out)

    ref = encoder_block_ref(x, valid_lens, params, num_heads=NH)
    # Tolerance accounts for bf16 MXU inputs (weights + activations) and the
    # approximate EUP reciprocal in the softmax denominator; reference is f32.
    np.testing.assert_allclose(np.asarray(out), np.asarray(ref), rtol=3e-2, atol=3e-2)

    print("KERNEL_OK")
</pallas_src>

<mosaic_0001>
module attributes {stable_mosaic.version = 11 : i64} {
  func.func @encoder_block_kernel(%arg0: i32, %arg1: memref<1x8x32xf32, #tpu.memory_space<vmem>>, %arg2: memref<1x1x1xi32, #tpu.memory_space<vmem>>, %arg3: memref<32x96xbf16, #tpu.memory_space<vmem>>, %arg4: memref<32x32xbf16, #tpu.memory_space<vmem>>, %arg5: memref<1x32xf32, #tpu.memory_space<vmem>>, %arg6: memref<1x32xf32, #tpu.memory_space<vmem>>, %arg7: memref<32x64xbf16, #tpu.memory_space<vmem>>, %arg8: memref<1x64xf32, #tpu.memory_space<vmem>>, %arg9: memref<64x32xbf16, #tpu.memory_space<vmem>>, %arg10: memref<1x32xf32, #tpu.memory_space<vmem>>, %arg11: memref<1x32xf32, #tpu.memory_space<vmem>>, %arg12: memref<1x32xf32, #tpu.memory_space<vmem>>, %arg13: memref<1x8x32xf32, #tpu.memory_space<vmem>>) attributes {dimension_semantics = [#tpu.dimension_semantics<parallel>], iteration_bounds = array<i64: 2>, scalar_prefetch = 0 : i64, scratch_operands = 0 : i64, tpu.core_type = #tpu.core_type<tc>, window_params = [{transform_indices = @transform_0, window_bounds = array<i64: 1, 8, 32>}, {transform_indices = @transform_1, window_bounds = array<i64: 1, 1, 1>}, {pipeline_mode = #tpu.pipeline_mode<synchronous>, transform_indices = @transform_2, window_bounds = array<i64: 32, 96>}, {pipeline_mode = #tpu.pipeline_mode<synchronous>, transform_indices = @transform_3, window_bounds = array<i64: 32, 32>}, {pipeline_mode = #tpu.pipeline_mode<synchronous>, transform_indices = @transform_4, window_bounds = array<i64: 1, 32>}, {pipeline_mode = #tpu.pipeline_mode<synchronous>, transform_indices = @transform_5, window_bounds = array<i64: 1, 32>}, {pipeline_mode = #tpu.pipeline_mode<synchronous>, transform_indices = @transform_6, window_bounds = array<i64: 32, 64>}, {pipeline_mode = #tpu.pipeline_mode<synchronous>, transform_indices = @transform_7, window_bounds = array<i64: 1, 64>}, {pipeline_mode = #tpu.pipeline_mode<synchronous>, transform_indices = @transform_8, window_bounds = array<i64: 64, 32>}, {pipeline_mode = #tpu.pipeline_mode<synchronous>, transform_indices = @transform_9, window_bounds = array<i64: 1, 32>}, {pipeline_mode = #tpu.pipeline_mode<synchronous>, transform_indices = @transform_10, window_bounds = array<i64: 1, 32>}, {pipeline_mode = #tpu.pipeline_mode<synchronous>, transform_indices = @transform_11, window_bounds = array<i64: 1, 32>}, {transform_indices = @transform_12, window_bounds = array<i64: 1, 8, 32>}]} {
    %c0 = arith.constant 0 : index
    %c0_0 = arith.constant 0 : index
    %c0_1 = arith.constant 0 : index
    %0 = vector.load %arg1[%c0, %c0_0, %c0_1] : memref<1x8x32xf32, #tpu.memory_space<vmem>>, vector<1x8x32xf32>
    %1 = vector.shape_cast %0 : vector<1x8x32xf32> to vector<8x32xf32>
    %2 = arith.truncf %1 : vector<8x32xf32> to vector<8x32xbf16>
    %c0_2 = arith.constant 0 : index
    %c0_3 = arith.constant 0 : index
    %3 = vector.load %arg3[%c0_2, %c0_3] : memref<32x96xbf16, #tpu.memory_space<vmem>>, vector<32x96xbf16>
    %cst = arith.constant dense<0.000000e+00> : vector<8x96xf32>
    %4 = tpu.matmul %2, %3, %cst {dimension_numbers = #tpu.dot_dimension_numbers<[1], [0], [0], [1], [0, 0, 1, 1], [], []>} : vector<8x32xbf16>, vector<32x96xbf16>, vector<8x96xf32> -> vector<8x96xf32>
    %5 = vector.extract_strided_slice %4 {offsets = [0, 0], sizes = [8, 32], strides = [1, 1]} : vector<8x96xf32> to vector<8x32xf32>
    %6 = vector.shape_cast %5 : vector<8x32xf32> to vector<1x8x32xf32>
    %7 = vector.extract_strided_slice %4 {offsets = [0, 32], sizes = [8, 32], strides = [1, 1]} : vector<8x96xf32> to vector<8x32xf32>
    %8 = vector.shape_cast %7 : vector<8x32xf32> to vector<1x8x32xf32>
    %9 = vector.extract_strided_slice %4 {offsets = [0, 64], sizes = [8, 32], strides = [1, 1]} : vector<8x96xf32> to vector<8x32xf32>
    %10 = arith.truncf %9 : vector<8x32xf32> to vector<8x32xbf16>
    %11 = vector.shape_cast %10 : vector<8x32xbf16> to vector<1x8x32xbf16>
    %c0_4 = arith.constant 0 : index
    %c0_5 = arith.constant 0 : index
    %c0_6 = arith.constant 0 : index
    %12 = vector.load %arg2[%c0_4, %c0_5, %c0_6] : memref<1x1x1xi32, #tpu.memory_space<vmem>>, vector<1x1x1xi32>
    %13 = tpu.iota {dimensions = array<i32: 2>} : vector<1x1x8xi32>
    %14 = vector.broadcast %12 : vector<1x1x1xi32> to vector<1x1x8xi32>
    %15 = arith.cmpi slt, %13, %14 : vector<1x1x8xi32>
    %16 = vector.extract_strided_slice %6 {offsets = [0, 0, 0], sizes = [1, 8, 8], strides = [1, 1, 1]} : vector<1x8x32xf32> to vector<1x8x8xf32>
    %17 = arith.truncf %16 : vector<1x8x8xf32> to vector<1x8x8xbf16>
    %18 = vector.extract_strided_slice %8 {offsets = [0, 0, 0], sizes = [1, 8, 8], strides = [1, 1, 1]} : vector<1x8x32xf32> to vector<1x8x8xf32>
    %19 = arith.truncf %18 : vector<1x8x8xf32> to vector<1x8x8xbf16>
    %20 = vector.extract_strided_slice %11 {offsets = [0, 0, 0], sizes = [1, 8, 8], strides = [1, 1, 1]} : vector<1x8x32xbf16> to vector<1x8x8xbf16>
    "tpu.trace_start"() <{level = 10 : i32, message = "bqd,bkd->bqk"}> : () -> ()
    %cst_7 = arith.constant dense<0.000000e+00> : vector<1x8x8xf32>
    %21 = tpu.matmul %17, %19, %cst_7 {dimension_numbers = #tpu.dot_dimension_numbers<[2], [2], [1], [1], [0, 0, 0, 1, 1, 1], [0], [0]>} : vector<1x8x8xbf16>, vector<1x8x8xbf16>, vector<1x8x8xf32> -> vector<1x8x8xf32>
    %cst_8 = arith.constant -1.000000e+06 : f32
    "tpu.trace_stop"() : () -> ()
    %22 = vector.shape_cast %15 : vector<1x1x8xi1> to vector<1x1x8xi1>
    %23 = vector.broadcast %22 : vector<1x1x8xi1> to vector<1x8x8xi1>
    %24 = vector.broadcast %cst_8 : f32 to vector<1x8x8xf32>
    %25 = arith.select %23, %21, %24 : vector<1x8x8xi1>, vector<1x8x8xf32>
    %cst_9 = arith.constant dense<0xFF800000> : vector<1x8xf32>
    %26 = vector.multi_reduction <maximumf>, %25, %cst_9 [2] : vector<1x8x8xf32> to vector<1x8xf32>
    %27 = vector.shape_cast %26 : vector<1x8xf32> to vector<1x8x1xf32>
    %28 = vector.broadcast %27 : vector<1x8x1xf32> to vector<1x8x8xf32>
    %29 = arith.subf %25, %28 : vector<1x8x8xf32>
    %30 = math.exp %29 : vector<1x8x8xf32>
    %cst_10 = arith.constant dense<0.000000e+00> : vector<1x8xf32>
    %31 = vector.multi_reduction <add>, %30, %cst_10 [2] : vector<1x8x8xf32> to vector<1x8xf32>
    %32 = vector.shape_cast %31 : vector<1x8xf32> to vector<1x8x1xf32>
    %33 = tpu.reciprocal %32 {approx = true} : vector<1x8x1xf32> -> vector<1x8x1xf32>
    %34 = vector.broadcast %33 : vector<1x8x1xf32> to vector<1x8x8xf32>
    %35 = arith.mulf %30, %34 : vector<1x8x8xf32>
    %36 = arith.truncf %35 : vector<1x8x8xf32> to vector<1x8x8xbf16>
    "tpu.trace_start"() <{level = 10 : i32, message = "bqk,bkd->bqd"}> : () -> ()
    %cst_11 = arith.constant dense<0.000000e+00> : vector<1x8x8xf32>
    %37 = tpu.matmul %36, %20, %cst_11 {dimension_numbers = #tpu.dot_dimension_numbers<[2], [1], [1], [2], [0, 0, 0, 1, 1, 2], [0], [0]>} : vector<1x8x8xbf16>, vector<1x8x8xbf16>, vector<1x8x8xf32> -> vector<1x8x8xf32>
    "tpu.trace_stop"() : () -> ()
    %38 = vector.extract_strided_slice %6 {offsets = [0, 0, 8], sizes = [1, 8, 8], strides = [1, 1, 1]} : vector<1x8x32xf32> to vector<1x8x8xf32>
    %39 = arith.truncf %38 : vector<1x8x8xf32> to vector<1x8x8xbf16>
    %40 = vector.extract_strided_slice %8 {offsets = [0, 0, 8], sizes = [1, 8, 8], strides = [1, 1, 1]} : vector<1x8x32xf32> to vector<1x8x8xf32>
    %41 = arith.truncf %40 : vector<1x8x8xf32> to vector<1x8x8xbf16>
    %42 = vector.extract_strided_slice %11 {offsets = [0, 0, 8], sizes = [1, 8, 8], strides = [1, 1, 1]} : vector<1x8x32xbf16> to vector<1x8x8xbf16>
    "tpu.trace_start"() <{level = 10 : i32, message = "bqd,bkd->bqk"}> : () -> ()
    %cst_12 = arith.constant dense<0.000000e+00> : vector<1x8x8xf32>
    %43 = tpu.matmul %39, %41, %cst_12 {dimension_numbers = #tpu.dot_dimension_numbers<[2], [2], [1], [1], [0, 0, 0, 1, 1, 1], [0], [0]>} : vector<1x8x8xbf16>, vector<1x8x8xbf16>, vector<1x8x8xf32> -> vector<1x8x8xf32>
    %cst_13 = arith.constant -1.000000e+06 : f32
    "tpu.trace_stop"() : () -> ()
    %44 = vector.shape_cast %15 : vector<1x1x8xi1> to vector<1x1x8xi1>
    %45 = vector.broadcast %44 : vector<1x1x8xi1> to vector<1x8x8xi1>
    %46 = vector.broadcast %cst_13 : f32 to vector<1x8x8xf32>
    %47 = arith.select %45, %43, %46 : vector<1x8x8xi1>, vector<1x8x8xf32>
    %cst_14 = arith.constant dense<0xFF800000> : vector<1x8xf32>
    %48 = vector.multi_reduction <maximumf>, %47, %cst_14 [2] : vector<1x8x8xf32> to vector<1x8xf32>
    %49 = vector.shape_cast %48 : vector<1x8xf32> to vector<1x8x1xf32>
    %50 = vector.broadcast %49 : vector<1x8x1xf32> to vector<1x8x8xf32>
    %51 = arith.subf %47, %50 : vector<1x8x8xf32>
    %52 = math.exp %51 : vector<1x8x8xf32>
    %cst_15 = arith.constant dense<0.000000e+00> : vector<1x8xf32>
    %53 = vector.multi_reduction <add>, %52, %cst_15 [2] : vector<1x8x8xf32> to vector<1x8xf32>
    %54 = vector.shape_cast %53 : vector<1x8xf32> to vector<1x8x1xf32>
    %55 = tpu.reciprocal %54 {approx = true} : vector<1x8x1xf32> -> vector<1x8x1xf32>
    %56 = vector.broadcast %55 : vector<1x8x1xf32> to vector<1x8x8xf32>
    %57 = arith.mulf %52, %56 : vector<1x8x8xf32>
    %58 = arith.truncf %57 : vector<1x8x8xf32> to vector<1x8x8xbf16>
    "tpu.trace_start"() <{level = 10 : i32, message = "bqk,bkd->bqd"}> : () -> ()
    %cst_16 = arith.constant dense<0.000000e+00> : vector<1x8x8xf32>
    %59 = tpu.matmul %58, %42, %cst_16 {dimension_numbers = #tpu.dot_dimension_numbers<[2], [1], [1], [2], [0, 0, 0, 1, 1, 2], [0], [0]>} : vector<1x8x8xbf16>, vector<1x8x8xbf16>, vector<1x8x8xf32> -> vector<1x8x8xf32>
    "tpu.trace_stop"() : () -> ()
    %60 = vector.extract_strided_slice %6 {offsets = [0, 0, 16], sizes = [1, 8, 8], strides = [1, 1, 1]} : vector<1x8x32xf32> to vector<1x8x8xf32>
    %61 = arith.truncf %60 : vector<1x8x8xf32> to vector<1x8x8xbf16>
    %62 = vector.extract_strided_slice %8 {offsets = [0, 0, 16], sizes = [1, 8, 8], strides = [1, 1, 1]} : vector<1x8x32xf32> to vector<1x8x8xf32>
    %63 = arith.truncf %62 : vector<1x8x8xf32> to vector<1x8x8xbf16>
    %64 = vector.extract_strided_slice %11 {offsets = [0, 0, 16], sizes = [1, 8, 8], strides = [1, 1, 1]} : vector<1x8x32xbf16> to vector<1x8x8xbf16>
    "tpu.trace_start"() <{level = 10 : i32, message = "bqd,bkd->bqk"}> : () -> ()
    %cst_17 = arith.constant dense<0.000000e+00> : vector<1x8x8xf32>
    %65 = tpu.matmul %61, %63, %cst_17 {dimension_numbers = #tpu.dot_dimension_numbers<[2], [2], [1], [1], [0, 0, 0, 1, 1, 1], [0], [0]>} : vector<1x8x8xbf16>, vector<1x8x8xbf16>, vector<1x8x8xf32> -> vector<1x8x8xf32>
    %cst_18 = arith.constant -1.000000e+06 : f32
    "tpu.trace_stop"() : () -> ()
    %66 = vector.shape_cast %15 : vector<1x1x8xi1> to vector<1x1x8xi1>
    %67 = vector.broadcast %66 : vector<1x1x8xi1> to vector<1x8x8xi1>
    %68 = vector.broadcast %cst_18 : f32 to vector<1x8x8xf32>
    %69 = arith.select %67, %65, %68 : vector<1x8x8xi1>, vector<1x8x8xf32>
    %cst_19 = arith.constant dense<0xFF800000> : vector<1x8xf32>
    %70 = vector.multi_reduction <maximumf>, %69, %cst_19 [2] : vector<1x8x8xf32> to vector<1x8xf32>
    %71 = vector.shape_cast %70 : vector<1x8xf32> to vector<1x8x1xf32>
    %72 = vector.broadcast %71 : vector<1x8x1xf32> to vector<1x8x8xf32>
    %73 = arith.subf %69, %72 : vector<1x8x8xf32>
    %74 = math.exp %73 : vector<1x8x8xf32>
    %cst_20 = arith.constant dense<0.000000e+00> : vector<1x8xf32>
    %75 = vector.multi_reduction <add>, %74, %cst_20 [2] : vector<1x8x8xf32> to vector<1x8xf32>
    %76 = vector.shape_cast %75 : vector<1x8xf32> to vector<1x8x1xf32>
    %77 = tpu.reciprocal %76 {approx = true} : vector<1x8x1xf32> -> vector<1x8x1xf32>
    %78 = vector.broadcast %77 : vector<1x8x1xf32> to vector<1x8x8xf32>
    %79 = arith.mulf %74, %78 : vector<1x8x8xf32>
    %80 = arith.truncf %79 : vector<1x8x8xf32> to vector<1x8x8xbf16>
    "tpu.trace_start"() <{level = 10 : i32, message = "bqk,bkd->bqd"}> : () -> ()
    %cst_21 = arith.constant dense<0.000000e+00> : vector<1x8x8xf32>
    %81 = tpu.matmul %80, %64, %cst_21 {dimension_numbers = #tpu.dot_dimension_numbers<[2], [1], [1], [2], [0, 0, 0, 1, 1, 2], [0], [0]>} : vector<1x8x8xbf16>, vector<1x8x8xbf16>, vector<1x8x8xf32> -> vector<1x8x8xf32>
    "tpu.trace_stop"() : () -> ()
    %82 = vector.extract_strided_slice %6 {offsets = [0, 0, 24], sizes = [1, 8, 8], strides = [1, 1, 1]} : vector<1x8x32xf32> to vector<1x8x8xf32>
    %83 = arith.truncf %82 : vector<1x8x8xf32> to vector<1x8x8xbf16>
    %84 = vector.extract_strided_slice %8 {offsets = [0, 0, 24], sizes = [1, 8, 8], strides = [1, 1, 1]} : vector<1x8x32xf32> to vector<1x8x8xf32>
    %85 = arith.truncf %84 : vector<1x8x8xf32> to vector<1x8x8xbf16>
    %86 = vector.extract_strided_slice %11 {offsets = [0, 0, 24], sizes = [1, 8, 8], strides = [1, 1, 1]} : vector<1x8x32xbf16> to vector<1x8x8xbf16>
    "tpu.trace_start"() <{level = 10 : i32, message = "bqd,bkd->bqk"}> : () -> ()
    %cst_22 = arith.constant dense<0.000000e+00> : vector<1x8x8xf32>
    %87 = tpu.matmul %83, %85, %cst_22 {dimension_numbers = #tpu.dot_dimension_numbers<[2], [2], [1], [1], [0, 0, 0, 1, 1, 1], [0], [0]>} : vector<1x8x8xbf16>, vector<1x8x8xbf16>, vector<1x8x8xf32> -> vector<1x8x8xf32>
    %cst_23 = arith.constant -1.000000e+06 : f32
    "tpu.trace_stop"() : () -> ()
    %88 = vector.shape_cast %15 : vector<1x1x8xi1> to vector<1x1x8xi1>
    %89 = vector.broadcast %88 : vector<1x1x8xi1> to vector<1x8x8xi1>
    %90 = vector.broadcast %cst_23 : f32 to vector<1x8x8xf32>
    %91 = arith.select %89, %87, %90 : vector<1x8x8xi1>, vector<1x8x8xf32>
    %cst_24 = arith.constant dense<0xFF800000> : vector<1x8xf32>
    %92 = vector.multi_reduction <maximumf>, %91, %cst_24 [2] : vector<1x8x8xf32> to vector<1x8xf32>
    %93 = vector.shape_cast %92 : vector<1x8xf32> to vector<1x8x1xf32>
    %94 = vector.broadcast %93 : vector<1x8x1xf32> to vector<1x8x8xf32>
    %95 = arith.subf %91, %94 : vector<1x8x8xf32>
    %96 = math.exp %95 : vector<1x8x8xf32>
    %cst_25 = arith.constant dense<0.000000e+00> : vector<1x8xf32>
    %97 = vector.multi_reduction <add>, %96, %cst_25 [2] : vector<1x8x8xf32> to vector<1x8xf32>
    %98 = vector.shape_cast %97 : vector<1x8xf32> to vector<1x8x1xf32>
    %99 = tpu.reciprocal %98 {approx = true} : vector<1x8x1xf32> -> vector<1x8x1xf32>
    %100 = vector.broadcast %99 : vector<1x8x1xf32> to vector<1x8x8xf32>
    %101 = arith.mulf %96, %100 : vector<1x8x8xf32>
    %102 = arith.truncf %101 : vector<1x8x8xf32> to vector<1x8x8xbf16>
    "tpu.trace_start"() <{level = 10 : i32, message = "bqk,bkd->bqd"}> : () -> ()
    %cst_26 = arith.constant dense<0.000000e+00> : vector<1x8x8xf32>
    %103 = tpu.matmul %102, %86, %cst_26 {dimension_numbers = #tpu.dot_dimension_numbers<[2], [1], [1], [2], [0, 0, 0, 1, 1, 2], [0], [0]>} : vector<1x8x8xbf16>, vector<1x8x8xbf16>, vector<1x8x8xf32> -> vector<1x8x8xf32>
    "tpu.trace_stop"() : () -> ()
    %104 = tpu.concatenate %37, %59, %81, %103 in 2 : vector<1x8x8xf32>, vector<1x8x8xf32>, vector<1x8x8xf32>, vector<1x8x8xf32> -> vector<1x8x32xf32>
    %105 = vector.shape_cast %104 : vector<1x8x32xf32> to vector<8x32xf32>
    %106 = arith.truncf %105 : vector<8x32xf32> to vector<8x32xbf16>
    %c0_27 = arith.constant 0 : index
    %c0_28 = arith.constant 0 : index
    %107 = vector.load %arg4[%c0_27, %c0_28] : memref<32x32xbf16, #tpu.memory_space<vmem>>, vector<32x32xbf16>
    %cst_29 = arith.constant dense<0.000000e+00> : vector<8x32xf32>
    %108 = tpu.matmul %106, %107, %cst_29 {dimension_numbers = #tpu.dot_dimension_numbers<[1], [0], [0], [1], [0, 0, 1, 1], [], []>} : vector<8x32xbf16>, vector<32x32xbf16>, vector<8x32xf32> -> vector<8x32xf32>
    %109 = arith.addf %1, %108 : vector<8x32xf32>
    %c0_30 = arith.constant 0 : index
    %c0_31 = arith.constant 0 : index
    %110 = vector.load %arg5[%c0_30, %c0_31] : memref<1x32xf32, #tpu.memory_space<vmem>>, vector<1x32xf32>
    %c0_32 = arith.constant 0 : index
    %c0_33 = arith.constant 0 : index
    %111 = vector.load %arg6[%c0_32, %c0_33] : memref<1x32xf32, #tpu.memory_space<vmem>>, vector<1x32xf32>
    %cst_34 = arith.constant dense<0.000000e+00> : vector<8xf32>
    %112 = vector.multi_reduction <add>, %109, %cst_34 [1] : vector<8x32xf32> to vector<8xf32>
    %113 = vector.shape_cast %112 : vector<8xf32> to vector<8x1xf32>
    %cst_35 = arith.constant 3.200000e+01 : f32
    %114 = vector.broadcast %cst_35 : f32 to vector<8x1xf32>
    %115 = arith.divf %113, %114 : vector<8x1xf32>
    %116 = vector.broadcast %115 : vector<8x1xf32> to vector<8x32xf32>
    %117 = arith.subf %109, %116 : vector<8x32xf32>
    %118 = arith.mulf %117, %117 : vector<8x32xf32>
    %cst_36 = arith.constant dense<0.000000e+00> : vector<8xf32>
    %119 = vector.multi_reduction <add>, %118, %cst_36 [1] : vector<8x32xf32> to vector<8xf32>
    %120 = vector.shape_cast %119 : vector<8xf32> to vector<8x1xf32>
    %cst_37 = arith.constant 3.200000e+01 : f32
    %121 = vector.broadcast %cst_37 : f32 to vector<8x1xf32>
    %122 = arith.divf %120, %121 : vector<8x1xf32>
    %123 = vector.broadcast %115 : vector<8x1xf32> to vector<8x32xf32>
    %124 = arith.subf %109, %123 : vector<8x32xf32>
    %cst_38 = arith.constant 9.99999974E-6 : f32
    %125 = vector.broadcast %cst_38 : f32 to vector<8x1xf32>
    %126 = arith.addf %122, %125 : vector<8x1xf32>
    %127 = math.rsqrt %126 : vector<8x1xf32>
    %128 = vector.broadcast %127 : vector<8x1xf32> to vector<8x32xf32>
    %129 = arith.mulf %124, %128 : vector<8x32xf32>
    %130 = vector.broadcast %110 : vector<1x32xf32> to vector<8x32xf32>
    %131 = arith.mulf %129, %130 : vector<8x32xf32>
    %132 = vector.broadcast %111 : vector<1x32xf32> to vector<8x32xf32>
    %133 = arith.addf %131, %132 : vector<8x32xf32>
    %134 = arith.truncf %133 : vector<8x32xf32> to vector<8x32xbf16>
    %c0_39 = arith.constant 0 : index
    %c0_40 = arith.constant 0 : index
    %135 = vector.load %arg7[%c0_39, %c0_40] : memref<32x64xbf16, #tpu.memory_space<vmem>>, vector<32x64xbf16>
    %cst_41 = arith.constant dense<0.000000e+00> : vector<8x64xf32>
    %136 = tpu.matmul %134, %135, %cst_41 {dimension_numbers = #tpu.dot_dimension_numbers<[1], [0], [0], [1], [0, 0, 1, 1], [], []>} : vector<8x32xbf16>, vector<32x64xbf16>, vector<8x64xf32> -> vector<8x64xf32>
    %c0_42 = arith.constant 0 : index
    %c0_43 = arith.constant 0 : index
    %137 = vector.load %arg8[%c0_42, %c0_43] : memref<1x64xf32, #tpu.memory_space<vmem>>, vector<1x64xf32>
    %138 = vector.broadcast %137 : vector<1x64xf32> to vector<8x64xf32>
    %139 = arith.addf %136, %138 : vector<8x64xf32>
    %cst_44 = arith.constant 0.000000e+00 : f32
    %140 = vector.broadcast %cst_44 : f32 to vector<8x64xf32>
    %141 = arith.maximumf %139, %140 : vector<8x64xf32>
    %142 = arith.truncf %141 : vector<8x64xf32> to vector<8x64xbf16>
    %c0_45 = arith.constant 0 : index
    %c0_46 = arith.constant 0 : index
    %143 = vector.load %arg9[%c0_45, %c0_46] : memref<64x32xbf16, #tpu.memory_space<vmem>>, vector<64x32xbf16>
    %cst_47 = arith.constant dense<0.000000e+00> : vector<8x32xf32>
    %144 = tpu.matmul %142, %143, %cst_47 {dimension_numbers = #tpu.dot_dimension_numbers<[1], [0], [0], [1], [0, 0, 1, 1], [], []>} : vector<8x64xbf16>, vector<64x32xbf16>, vector<8x32xf32> -> vector<8x32xf32>
    %c0_48 = arith.constant 0 : index
    %c0_49 = arith.constant 0 : index
    %145 = vector.load %arg10[%c0_48, %c0_49] : memref<1x32xf32, #tpu.memory_space<vmem>>, vector<1x32xf32>
    %146 = vector.broadcast %145 : vector<1x32xf32> to vector<8x32xf32>
    %147 = arith.addf %144, %146 : vector<8x32xf32>
    %148 = arith.addf %133, %147 : vector<8x32xf32>
    %c0_50 = arith.constant 0 : index
    %c0_51 = arith.constant 0 : index
    %149 = vector.load %arg11[%c0_50, %c0_51] : memref<1x32xf32, #tpu.memory_space<vmem>>, vector<1x32xf32>
    %c0_52 = arith.constant 0 : index
    %c0_53 = arith.constant 0 : index
    %150 = vector.load %arg12[%c0_52, %c0_53] : memref<1x32xf32, #tpu.memory_space<vmem>>, vector<1x32xf32>
    %cst_54 = arith.constant dense<0.000000e+00> : vector<8xf32>
    %151 = vector.multi_reduction <add>, %148, %cst_54 [1] : vector<8x32xf32> to vector<8xf32>
    %152 = vector.shape_cast %151 : vector<8xf32> to vector<8x1xf32>
    %cst_55 = arith.constant 3.200000e+01 : f32
    %153 = vector.broadcast %cst_55 : f32 to vector<8x1xf32>
    %154 = arith.divf %152, %153 : vector<8x1xf32>
    %155 = vector.broadcast %154 : vector<8x1xf32> to vector<8x32xf32>
    %156 = arith.subf %148, %155 : vector<8x32xf32>
    %157 = arith.mulf %156, %156 : vector<8x32xf32>
    %cst_56 = arith.constant dense<0.000000e+00> : vector<8xf32>
    %158 = vector.multi_reduction <add>, %157, %cst_56 [1] : vector<8x32xf32> to vector<8xf32>
    %159 = vector.shape_cast %158 : vector<8xf32> to vector<8x1xf32>
    %cst_57 = arith.constant 3.200000e+01 : f32
    %160 = vector.broadcast %cst_57 : f32 to vector<8x1xf32>
    %161 = arith.divf %159, %160 : vector<8x1xf32>
    %162 = vector.broadcast %154 : vector<8x1xf32> to vector<8x32xf32>
    %163 = arith.subf %148, %162 : vector<8x32xf32>
    %cst_58 = arith.constant 9.99999974E-6 : f32
    %164 = vector.broadcast %cst_58 : f32 to vector<8x1xf32>
    %165 = arith.addf %161, %164 : vector<8x1xf32>
    %166 = math.rsqrt %165 : vector<8x1xf32>
    %167 = vector.broadcast %166 : vector<8x1xf32> to vector<8x32xf32>
    %168 = arith.mulf %163, %167 : vector<8x32xf32>
    %169 = vector.broadcast %149 : vector<1x32xf32> to vector<8x32xf32>
    %170 = arith.mulf %168, %169 : vector<8x32xf32>
    %171 = vector.broadcast %150 : vector<1x32xf32> to vector<8x32xf32>
    %172 = arith.addf %170, %171 : vector<8x32xf32>
    %173 = vector.shape_cast %172 : vector<8x32xf32> to vector<1x8x32xf32>
    %c0_59 = arith.constant 0 : index
    %c0_60 = arith.constant 0 : index
    %c0_61 = arith.constant 0 : index
    %174 = vector.load %arg13[%c0_59, %c0_60, %c0_61] : memref<1x8x32xf32, #tpu.memory_space<vmem>>, vector<1x8x32xf32>
    tpu.vector_store %arg13[%c0_59, %c0_60, %c0_61], %173 {strides = array<i32>} : memref<1x8x32xf32, #tpu.memory_space<vmem>>, vector<1x8x32xf32>,
    return
  }
  func.func @transform_0(%arg0: i32) -> (i32, i32, i32) {
    %c0_i32 = arith.constant 0 : i32
    %c0_i32_0 = arith.constant 0 : i32
    %c0_i32_1 = arith.constant 0 : i32
    return %arg0, %c0_i32, %c0_i32_0 : i32, i32, i32
  }
  func.func @transform_1(%arg0: i32) -> (i32, i32, i32) {
    %c0_i32 = arith.constant 0 : i32
    %c0_i32_0 = arith.constant 0 : i32
    %c0_i32_1 = arith.constant 0 : i32
    return %arg0, %c0_i32, %c0_i32_0 : i32, i32, i32
  }
  func.func @transform_2(%arg0: i32) -> (i32, i32) {
    %c0_i32 = arith.constant 0 : i32
    %c0_i32_0 = arith.constant 0 : i32
    %c0_i32_1 = arith.constant 0 : i32
    return %c0_i32, %c0_i32_0 : i32, i32
  }
  func.func @transform_3(%arg0: i32) -> (i32, i32) {
    %c0_i32 = arith.constant 0 : i32
    %c0_i32_0 = arith.constant 0 : i32
    %c0_i32_1 = arith.constant 0 : i32
    return %c0_i32, %c0_i32_0 : i32, i32
  }
  func.func @transform_4(%arg0: i32) -> (i32, i32) {
    %c0_i32 = arith.constant 0 : i32
    %c0_i32_0 = arith.constant 0 : i32
    %c0_i32_1 = arith.constant 0 : i32
    return %c0_i32, %c0_i32_0 : i32, i32
  }
  func.func @transform_5(%arg0: i32) -> (i32, i32) {
    %c0_i32 = arith.constant 0 : i32
    %c0_i32_0 = arith.constant 0 : i32
    %c0_i32_1 = arith.constant 0 : i32
    return %c0_i32, %c0_i32_0 : i32, i32
  }
  func.func @transform_6(%arg0: i32) -> (i32, i32) {
    %c0_i32 = arith.constant 0 : i32
    %c0_i32_0 = arith.constant 0 : i32
    %c0_i32_1 = arith.constant 0 : i32
    return %c0_i32, %c0_i32_0 : i32, i32
  }
  func.func @transform_7(%arg0: i32) -> (i32, i32) {
    %c0_i32 = arith.constant 0 : i32
    %c0_i32_0 = arith.constant 0 : i32
    %c0_i32_1 = arith.constant 0 : i32
    return %c0_i32, %c0_i32_0 : i32, i32
  }
  func.func @transform_8(%arg0: i32) -> (i32, i32) {
    %c0_i32 = arith.constant 0 : i32
    %c0_i32_0 = arith.constant 0 : i32
    %c0_i32_1 = arith.constant 0 : i32
    return %c0_i32, %c0_i32_0 : i32, i32
  }
  func.func @transform_9(%arg0: i32) -> (i32, i32) {
    %c0_i32 = arith.constant 0 : i32
    %c0_i32_0 = arith.constant 0 : i32
    %c0_i32_1 = arith.constant 0 : i32
    return %c0_i32, %c0_i32_0 : i32, i32
  }
  func.func @transform_10(%arg0: i32) -> (i32, i32) {
    %c0_i32 = arith.constant 0 : i32
    %c0_i32_0 = arith.constant 0 : i32
    %c0_i32_1 = arith.constant 0 : i32
    return %c0_i32, %c0_i32_0 : i32, i32
  }
  func.func @transform_11(%arg0: i32) -> (i32, i32) {
    %c0_i32 = arith.constant 0 : i32
    %c0_i32_0 = arith.constant 0 : i32
    %c0_i32_1 = arith.constant 0 : i32
    return %c0_i32, %c0_i32_0 : i32, i32
  }
  func.func @transform_12(%arg0: i32) -> (i32, i32, i32) {
    %c0_i32 = arith.constant 0 : i32
    %c0_i32_0 = arith.constant 0 : i32
    %c0_i32_1 = arith.constant 0 : i32
    return %arg0, %c0_i32, %c0_i32_0 : i32, i32, i32
  }
}

</mosaic_0001>

<bundles_post_ra>
// kernel: tpu_custom_call.1
= control target key start
LH: loop header
LB: loop body
LE: loop exit
PB: predicated region body
PF: predicated region fallthrough
CT: control target
= control target key end

     0   :  { %s1591_s0 = inlined_call_operand.vmem [shape: f32[2,8,32], index: 0, kind: input, shape index: {}]   ;;  %s1592_s1 = inlined_call_operand.vmem [shape: s32[2,1,1], index: 1, kind: input, shape index: {}]   ;;  %s1593_s2 = inlined_call_operand.vmem [shape: bf16[32,96], index: 2, kind: input, shape index: {}]   ;;  %s1594_s3 = inlined_call_operand.vmem [shape: bf16[32,32], index: 3, kind: input, shape index: {}]   ;;  %s1595_s4 = inlined_call_operand.vmem [shape: f32[1,32], index: 4, kind: input, shape index: {}]   ;;  %s1596_s5 = inlined_call_operand.vmem [shape: f32[1,32], index: 5, kind: input, shape index: {}]   ;;  %s1597_s6 = inlined_call_operand.hbm [shape: bf16[32,64], index: 6, kind: input, shape index: {}]   ;;  %s1598_s7 = inlined_call_operand.vmem [shape: f32[1,64], index: 7, kind: input, shape index: {}]   ;;  %s1599_s8 = inlined_call_operand.vmem [shape: bf16[64,32], index: 8, kind: input, shape index: {}]   ;;  %s1600_s9 = inlined_call_operand.vmem [shape: f32[1,32], index: 9, kind: input, shape index: {}]   ;;  %s1601_s10 = inlined_call_operand.vmem [shape: f32[1,32], index: 10, kind: input, shape index: {}]   ;;  %s1602_s11 = inlined_call_operand.vmem [shape: f32[1,32], index: 11, kind: input, shape index: {}]   ;;  %s1603_s12 = inlined_call_operand.hbm [shape: f32[2,8,32], index: 12, kind: output, shape index: {}]  }
   0x1   :  { %1604 = sst [smem:[#allocation8_spill]] %s1591_s0 }
   0x2   :  { %1605 = sst [smem:[#allocation9_spill]] %s1592_s1 }
   0x3   :  { %1606 = sst [smem:[#allocation10_spill]] %s1597_s6 }
   0x4   :  { %17 = vsyncpa [#allocation3], 0 }
   0x5   :  { %18 = vsyncpa [#allocation4], 0 }
   0x6   :  { %20 = vsyncpa [#allocation4 + $0x1], 0  ;;  %s1384_s21 = smov 0   ;;  %s1386_s22 = smov 0  }
   0x7   :  { %s1388_s23 = smov 0   ;;  %s1390_s24 = smov 0  }
   0x8 LB: > { %s1405_s25 = sadd.s32 4294967295, %s1298_s24   ;;  %s1030_s26 = sadd.s32 4294967294, %s1298_s24   ;;  %s1298_s24 = sphi %s1390_s24, %s1617_s24   ;;  %s1294_s23 = sphi %s1388_s23, %s1616_s23   ;;  %s1290_s22 = sphi %s1386_s22, %s1615_s22   ;;  %s1286_s21 = sphi %s1384_s21, %s1614_s21  }
   0x9   : > { %s1409_s27 = sadd.s32 1, %s1298_s24   ;;  %s295_s28 = sadd.s32 1, %s1294_s23 }
   0xa   : > { %s292_s29 = ssub.s32 %s1298_s24, %s1409_s27  ;;  %p305_p0 = scmp.ne.s32.totalorder %s1294_s23, %s1290_s22 }
   0xb   : > { %p293_p1 = scmp.eq.s32.totalorder %s292_s29, 0  ;;  %p306_p2 = scmp.eq.s32.totalorder %s1405_s25, 1 }
   0xc   : > { %p311_p3 = scmp.ne.s32.totalorder %s1290_s22, %s1286_s21  ;;  %p312_p4 = scmp.eq.s32.totalorder %s1030_s26, 1 }
   0xd   : > { %s1420_s30 = scalar_select %p293_p1, %s1294_s23, %s295_s28  }
   0xe   : > { %p1422_p5 = por %p306_p2, %p305_p0  ;;  %p1426_p6 = por %p312_p4, %p311_p3 }
   0xf   : > { %p1031_p7 = scmp.ge.s32.totalorder %s1298_s24, 1  ;;  %p319_p8 = scmp.lt.s32.totalorder %s1298_s24, 3 }
  0x10   : > { %p1118_p9 = scmp.eq.s32.totalorder %s1405_s25, 0  ;;  %s1609_s6 = sld [smem:[#allocation10_spill]] }
  0x11   : > { %p320_p10 = pnand %p1031_p7, %p319_p8  ;;  %s1300_s18 = smov [#allocation2]  }
  0x12   : > { %s344_s19 = sshll.u32 %s1300_s18, 4  ;;  %s1301_s20 = smov 64   ;;  %s345_s19 = int_to_ptr.vmem [resolvable:$true] %s344_s19 }
  0x13   : > { %p1110_p11 = pneg %p320_p10  ;;  %s1302_s26 = smov 4  }
  0x14   : > { %388 = sbr.rel (%p320_p10) target bundleno = 1894 (0x766), region = 68 }
  0x15   : > { %p1111_p12 = pnand %p1118_p9, %p1110_p11 }
  0x16   : > { %s342_s17 = sshll.u32 %s1609_s6, 4  ;;  %s343_s17 = int_to_ptr.hbm [resolvable:$true] %s342_s17 }
  0x17   : > { %1113 = dma.hbm_to_vmem [thread:$0]  (!%p1111_p12), %s343_s17, 256, %s345_s19, [#allocation3], %s1301_s20, %s1301_s20, %s1302_s26  }
  0x19   : > { %1277 = dma.done.wait (%p1118_p9), [#allocation3], 256  }
  0x1a   : > { %1279 = vsyncadd (%p1118_p9), [#allocation3], 4294967040  ;;  %p433_p13 = scmp.lt.s32.totalorder %s1405_s25, 1  ;;  %s1610_s0 = sld [smem:[#allocation8_spill]]  ;;  %v1095_v0 = vld [vmem:[%s1593_s2 + $0x8] sm:$0xff]  ;;  %v1094_v1 = vld [vmem:[%s1593_s2] sm:$0xff]  ;;  %v478_v22 = vlaneseq }
  0x1b   : > { %469 = vmatpush.bf16.msra.mxu0 %v1095_v0  ;;  %vm459_vm0 = vcmask 261120   ;;  %s1303_s6 = smov 104   ;;  %s1304_s26 = smov 120   ;;  %v1310_v10 = vmov 0   ;;  %vm490_vm1 = vcmask 64512   ;;  %vm530_vm3 = vcmask 1043456  }
  0x1c   : > { %s1444_s28 = scalar_select %p433_p13, %s1405_s25, 1  ;;  %1172 = vset.pattern.permute.xlu1 %v1310_v10  ;;  %1173 = vset.pattern.permute.xlu0 %v1310_v10  ;;  %v479_v24 = vand.u32 127, %v478_v22  ;;  %vm731_vm4 = vcmask 130048   ;;  %vm733_vm5 = vcmask 195584   ;;  %vm883_vm10 = vcmask 523264  }
  0x1d   : > { %s1306_s15 = smov 80   ;;  %s1307_s16 = smov 72  }
  0x1e   : > { %s1037_s29 = sshll.u32 %s1444_s28, 3  ;;  %s1309_s17 = smov 112  }
  0x1f   : > { %470 = vmatpush.bf16.msra.mxu0 %v1094_v1  ;;  %s1611_s1 = sld [smem:[#allocation9_spill]]  ;;  %s430_s19 = sand.u32 1, %s1290_s22  }
  0x20   : > { %s436_s18 = scalar_lea.vmem %s1610_s0, %s1037_s29  ;;  %s1305_s29 = smov 96  }
  0x21   : > { %v1456_v2 = vld [vmem:[%s436_s18] sm:$0xff]  ;;  %s1308_s18 = smov 88   ;;  %s1036_s20 = sshll.u32 %s430_s19, 3 }
  0x22   : > { %v442_v3 = vpack.c.bf16 %v1456_v2, %v1456_v2  ;;  %s432_s0 = scalar_lea.vmem [#allocation5], %s1036_s20  ;;  %s1252_s20 = scalar_lea.hbm %s1603_s12, 16 }
  0x24   : > { %1046 = vmatmul.msk.bf16.vlgmr.msra.gmra.mxu0 %vm459_vm0, %v442_v3 }
  0xa1   : > { %v472_v4 = vpop.f32.mrf.mxu0 }
  0xa2   : > { %v476_v5 = vpack.c.bf16 %v472_v4, %v472_v4 }
  0xa4   : > { %v486_v6 = vunpack.c.l.b16 %v476_v5 }
  0xa6   : > { %v1461_v7 = vpack.c.b16 %v486_v6, %v486_v6 }
  0xa8   : > { %661 = vrot.lane.b32.xlu2 %v1461_v7, %s1303_s6  ;;  %547 = vrot.lane.b32.xlu1 %v1461_v7, %s1304_s26  ;;  %s439_s6 = scalar_lea.vmem %s1611_s1, %s1444_s28  ;;  %s1311_s28 = smov 64  }
  0xa9   : > { %488 = vrot.lane.b32.xlu0 %v1461_v7, %s1305_s29  ;;  %v474_v8 = vpop.f32.mrf.mxu0  ;;  %v477_v13 = vld [vmem:[%s439_s6] sm:$0x1]  ;;  %s1312_s26 = smov 40   ;;  %s1313_s29 = smov 56  }
  0xaa   : > { %s1091_s6 = sshll.u32 %s1405_s25, 3  ;;  %s947_s25 = sshll.u32 %s432_s0, 4  ;;  %s948_s25 = int_to_ptr.vmem [resolvable:$true] %s947_s25 }
  0xb0   : > { %606 = vrot.lane.b32.xlu2 %v1461_v7, %s1306_s15  ;;  %663 = vrot.lane.b32.xlu1 %v1461_v7, %s1307_s16  ;;  %s1314_s15 = smov 48   ;;  %s1315_s16 = smov 8  }
  0xb1   : > { %549 = vrot.lane.b32.xlu0 %v1461_v7, %s1308_s18  ;;  %s1316_s18 = smov 24  }
  0xb8   : > { %481 = vperm.xlu1 %1172, %v477_v13  }
  0xb9   : > { %604 = vrot.lane.b32.xlu0 %v1461_v7, %s1309_s17  ;;  %s1317_s17 = smov 16  }
 0x102   : > { %v662_v9 = vpop.permute.xlu2 %661 }
 0x10a   : > { %v607_v11 = vpop.permute.xlu2 %606 }
 0x10b   : > { %v612_v12 = vsel %vm490_vm1, %v607_v11, 0 }
 0x10c   : > { %621 = vmatpush.bf16.xpose.msrb.mxu0 %v612_v12 }
 0x11a   : > { %v548_v14 = vpop.permute.xlu1 %547 }
 0x11b   : > { %v489_v15 = vpop.permute.xlu0 %488 }
 0x11c   : > { %v495_v16 = vsel %vm490_vm1, %v489_v15, 0 }
 0x11d   : > { %504 = vmatpush.bf16.xpose.msra.mxu1 %v495_v16 }
 0x122   : > { %v664_v17 = vpop.permute.xlu1 %663 }
 0x123   : > { %v550_v18 = vpop.permute.xlu0 %549  ;;  %v669_v19 = vsel %vm490_vm1, %v664_v17, 0 }
 0x124   : > { %1047 = vmatmul.msk.bf16.vlgmr.msra.gmra.mxu1 %vm490_vm1, %v476_v5  ;;  %v555_v20 = vsel %vm490_vm1, %v550_v18, 0 }
 0x125   : > { %564 = vmatpush.bf16.xpose.msra.mxu3 %v555_v20 }
 0x12a   : > { %v482_v23 = vpop.permute.xlu1 %481 }
 0x12b   : > { %v605_v21 = vpop.permute.xlu0 %604  ;;  %v483_v25 = vperm.slane %v482_v23, 0 }
 0x12c   : > { %1049 = vmatmul.msk.bf16.vlgmr.msra.gmra.mxu3 %vm490_vm1, %v548_v14  ;;  %1051 = vmatmul.msk.bf16.vlgmr.msrb.gmra.mxu0 %vm490_vm1, %v605_v21 }
 0x12d   : > { %678 = vmatpush.bf16.xpose.msrb.mxu3 %v669_v19  ;;  %vm1482_vm2 = vcmp.lt.s32.totalorder %v479_v24, %v483_v25 }
 0x13c   : > { %1053 = vmatmul.msk.bf16.vlgmr.msrb.gmra.mxu3 %vm490_vm1, %v662_v9 }
 0x1a1   : > { %v506_v27 = vpop.f32.mrf.mxu1 }
 0x1a2   : > { %v512_v28 = vsel %vm1482_vm2, %v506_v27, -1000000.0 }
 0x1a3   : > { %v513_v29 = vsel %vm490_vm1, %v512_v28, -inf }
 0x1a4   : > { %514 = vmax.xlane.f32.xlu2 %v513_v29 }
 0x1a9   : > { %v508_v30 = vpop.f32.mrf.mxu1  ;;  %v623_v31 = vpop.f32.mrf.mxu0 }
 0x1aa   : > { %v627_v32 = vsel %vm1482_vm2, %v623_v31, -1000000.0 }
 0x1ab   : > { %v628_v33 = vsel %vm490_vm1, %v627_v32, -inf }
 0x1ac   : > { %629 = vmax.xlane.f32.xlu2 %v628_v33  ;;  %v1096_v33 = vld [vmem:[%s1594_s3] sm:$0xff] }
 0x1af   : > { %v566_v34 = vpop.f32.mrf.mxu3 }
 0x1b0   : > { %v570_v35 = vsel %vm1482_vm2, %v566_v34, -1000000.0 }
 0x1b1   : > { %v625_v36 = vpop.f32.mrf.mxu0  ;;  %v571_v37 = vsel %vm490_vm1, %v570_v35, -inf }
 0x1b2   : > { %572 = vmax.xlane.f32.xlu0 %v571_v37 }
 0x1b7   : > { %v568_v38 = vpop.f32.mrf.mxu3 }
 0x1bf   : > { %v680_v39 = vpop.f32.mrf.mxu3 }
 0x1c0   : > { %v684_v40 = vsel %vm1482_vm2, %v680_v39, -1000000.0 }
 0x1c1   : > { %v685_v41 = vsel %vm490_vm1, %v684_v40, -inf }
 0x1c2   : > { %686 = vmax.xlane.f32.xlu1 %v685_v41 }
 0x1c6   : > { %525 = vrot.lane.b32.xlu0 %v1461_v7, %s1311_s28  ;;  %s935_s28 = scalar_lea.sflag [#allocation4], %s430_s19 }
 0x1c7   : > { %v682_v42 = vpop.f32.mrf.mxu3 }
 0x1ce   : > { %697 = vrot.lane.b32.xlu0 %v1461_v7, %s1312_s26 }
 0x217   : > { %v515_v43 = vpop.xlane.xlu2 %514 }
 0x218   : > { %v516_v44 = vsub.f32 %v512_v28, %v515_v43 }
 0x21a   : > { %v517_v45 = vmul.f32 1.442695, %v516_v44 }
 0x21c   : > { %1180 = vpow2.f32 %v517_v45  ;;  %v1318_v45 = vmov 32.0  }
 0x21f   : > { %v630_v46 = vpop.xlane.xlu2 %629 }
 0x220   : > { %v631_v47 = vsub.f32 %v627_v32, %v630_v46  ;;  %v1097_v32 = vld [vmem:[%s1594_s3 + $0x8] sm:$0xff] }
 0x221   : > { %761 = vmatpush.bf16.msra.mxu0 %v1097_v32 }
 0x222   : > { %v1181_v48 = vpop.eup %1180  ;;  %v632_v49 = vmul.f32 1.442695, %v631_v47 }
 0x223   : > { %v519_v50 = vsel %vm490_vm1, %v1181_v48, 0.0 }
 0x224   : > { %1182 = vpow2.f32 %v632_v49  ;;  %520 = vadd.xlane.f32.xlu2 %v519_v50 }
 0x225   : > { %v573_v51 = vpop.xlane.xlu0 %572  ;;  %762 = vmatpush.bf16.msra.mxu0 %v1096_v33 }
 0x226   : > { %v574_v52 = vsub.f32 %v570_v35, %v573_v51 }
 0x228   : > { %v575_v53 = vmul.f32 1.442695, %v574_v52 }
 0x22a   : > { %v1183_v54 = vpop.eup %1182  ;;  %1184 = vpow2.f32 %v575_v53 }
 0x22b   : > { %v634_v55 = vsel %vm490_vm1, %v1183_v54, 0.0 }
 0x22c   : > { %635 = vadd.xlane.f32.xlu1 %v634_v55 }
 0x230   : > { %v1185_v56 = vpop.eup %1184 }
 0x231   : > { %v577_v57 = vsel %vm490_vm1, %v1185_v56, 0.0 }
 0x234   : > { %578 = vadd.xlane.f32.xlu1 %v577_v57  ;;  %v1098_v57 = vld [vmem:[#allocation2] sm:$0xff] }
 0x235   : > { %v687_v58 = vpop.xlane.xlu1 %686 }
 0x236   : > { %v688_v59 = vsub.f32 %v684_v40, %v687_v58  ;;  %v1103_v58 = vld [vmem:[%s1599_s8 + $0x18] sm:$0xff] }
 0x237   : > { %891 = vmatpush.bf16.msra.mxu3 %v1103_v58 }
 0x238   : > { %v689_v60 = vmul.f32 1.442695, %v688_v59  ;;  %v526_v61 = vpop.permute.xlu0 %525 }
 0x239   : > { %v532_v62 = vsel %vm530_vm3, %v526_v61, 0  ;;  %v1102_v61 = vld [vmem:[%s1599_s8 + $0x10] sm:$0xff] }
 0x23a   : > { %1186 = vpow2.f32 %v689_v60  ;;  %541 = vmatpush.bf16.msra.mxu2 %v532_v62 }
 0x23b   : > { %892 = vmatpush.bf16.msra.mxu3 %v1102_v61 }
 0x23c   : > { %583 = vrot.lane.b32.xlu2 %v1461_v7, %s1313_s29 }
 0x240   : > { %v1187_v63 = vpop.eup %1186  ;;  %v698_v8 = vpop.permute.xlu0 %697 }
 0x241   : > { %v691_v0 = vsel %vm490_vm1, %v1187_v63, 0.0  ;;  %v703_v11 = vsel %vm530_vm3, %v698_v8, 0  ;;  %v1174_v8 = vld [vmem:[%s1595_s4] ss:$0 sm:$0xff] }
 0x242   : > { %692 = vadd.xlane.f32.xlu1 %v691_v0 }
 0x25b   : > { %640 = vrot.lane.b32.xlu1 %v1461_v7, %s1314_s15 }
 0x297   : > { %v521_v1 = vpop.xlane.xlu2 %520 }
 0x298   : > { %1188 = vrcp.f32 %v521_v1 }
 0x29e   : > { %v1189_v3 = vpop.eup %1188 }
 0x29f   : > { %v636_v4 = vpop.xlane.xlu1 %635  ;;  %v584_v5 = vpop.permute.xlu2 %583  ;;  %v523_v6 = vmul.f32 %v1189_v3, %v1181_v48 }
 0x2a0   : > { %v589_v9 = vsel %vm530_vm3, %v584_v5, 0 }
 0x2a1   : > { %598 = vmatpush.bf16.msrb.mxu2 %v589_v9  ;;  %v524_v10 = vpack.c.bf16 %v523_v6, %v523_v6 }
 0x2a3   : > { %1048 = vmatmul.msk.bf16.vlgmr.msra.gmra.mxu2 %vm490_vm1, %v524_v10  ;;  %v1175_v10 = vld [vmem:[%s1596_s5] ss:$0 sm:$0xff] }
 0x2a5   : > { %712 = vmatpush.bf16.msra.mxu2 %v703_v11 }
 0x2a7   : > { %v579_v12 = vpop.xlane.xlu1 %578 }
 0x2a8   : > { %1190 = vrcp.f32 %v579_v12 }
 0x2ae   : > { %v1191_v13 = vpop.eup %1190 }
 0x2af   : > { %v581_v7 = vmul.f32 %v1191_v13, %v1185_v56 }
 0x2b1   : > { %v582_v14 = vpack.c.bf16 %v581_v7, %v581_v7 }
 0x2b3   : > { %1050 = vmatmul.msk.bf16.vlgmr.msrb.gmra.mxu2 %vm490_vm1, %v582_v14  ;;  %v1100_v14 = vld [vmem:[%s1599_s8] sm:$0xff] }
 0x2b5   : > { %v693_v15 = vpop.xlane.xlu1 %692 }
 0x2b6   : > { %1192 = vrcp.f32 %v693_v15  ;;  %v1176_v15 = vld [vmem:[%s1598_s7] ss:$0 sm:$0xff] }
 0x2b7   : > { %1194 = vrcp.f32 %v636_v4 }
 0x2b8   : > { %1196 = vrcp.f32 %v1318_v45 }
 0x2bc   : > { %v1193_v16 = vpop.eup %1192 }
 0x2bd   : > { %v695_v17 = vmul.f32 %v1193_v16, %v1187_v63  ;;  %v1195_v19 = vpop.eup %1194  ;;  %v1101_v63 = vld [vmem:[%s1599_s8 + $0x8] sm:$0xff] }
 0x2be   : > { %v638_v20 = vmul.f32 %v1195_v19, %v1183_v54  ;;  %v1197_v46 = vpop.eup %1196  ;;  %893 = vmatpush.bf16.msra.mxu3 %v1101_v63 }
 0x2bf   : > { %v696_v18 = vpack.c.bf16 %v695_v17, %v695_v17  ;;  %v775_v47 = vmul.f32 32.0, %v1197_v46  ;;  %vm779_vm6 = vweird.f32 %v1197_v46 }
 0x2c0   : > { %v639_v23 = vpack.c.bf16 %v638_v20, %v638_v20 }
 0x2c1   : > { %v776_v48 = vsub.f32 1.0, %v775_v47 }
 0x2c2   : > { %894 = vmatpush.bf16.msra.mxu3 %v1100_v14 }
 0x2c3   : > { %1054 = vmatmul.msk.bf16.vlgmr.msra.gmra.mxu2 %vm490_vm1, %v696_v18  ;;  %v777_v49 = vmul.f32 %v1197_v46, %v776_v48 }
 0x2c5   : > { %v778_v50 = vadd.f32 %v1197_v46, %v777_v49 }
 0x2c7   : > { %v780_v51 = vsel %vm779_vm6, %v1197_v46, %v778_v50 }
 0x2cd   : > { %v641_v21 = vpop.permute.xlu1 %640 }
 0x2ce   : > { %v646_v22 = vsel %vm530_vm3, %v641_v21, 0  ;;  %v1177_v21 = vld [vmem:[%s1600_s9] ss:$0 sm:$0xff] }
 0x2cf   : > { %655 = vmatpush.bf16.msrb.mxu1 %v646_v22 }
 0x2d2   : > { %1052 = vmatmul.msk.bf16.vlgmr.msrb.gmra.mxu1 %vm490_vm1, %v639_v23 }
 0x326   : > { %v543_v24 = vpop.f32.mrf.mxu2 }
 0x32e   : > { %v545_v25 = vpop.f32.mrf.mxu2 }
 0x336   : > { %v600_v26 = vpop.f32.mrf.mxu2 }
 0x337   : > { %719 = vrot.lane.b32.xlu0 %v600_v26, %s1315_s16  ;;  %s945_s16 = scalar_lea.hbm %s1603_s12, %s1091_s6 }
 0x338   : > { %s949_s1 = sshll.u32 %s945_s16, 4  ;;  %s950_s1 = int_to_ptr.hbm [resolvable:$true] %s949_s1 }
 0x339   : > { %s1246_s26 = sshra.s32 %s950_s1, 4  ;;  %s1247_s26 = int_to_ptr.hbm [resolvable:$true] %s1246_s26 }
 0x33a   : > { %s1248_s6 = scalar_lea.hbm %s1247_s26, 8  ;;  %p1253_p3 = scmp.lt.s32.totalorder %s1247_s26, %s1603_s12 }
 0x33b   : > { %p1249_p0 = scmp.ne.s32.totalorder %s1247_s26, %s1248_s6  ;;  %p1254_p4 = scmp.lt.s32.totalorder %s1252_s20, %s1248_s6 }
 0x33d   : > { %p1250_p1 = pnand %p1249_p0, %p1422_p5  ;;  %p1255_p7 = por %p1254_p4, %p1253_p3 }
 0x33e   : > { %v602_v27 = vpop.f32.mrf.mxu2 }
 0x33f   : > { %p1251_p2 = pneg %p1250_p1 }
 0x341   : > { %p1256_p8 = pnand %p1255_p7, %p1251_p2 }
 0x346   : > { %v714_v28 = vpop.f32.mrf.mxu2 }
 0x347   : > { %727 = vrot.lane.b32.xlu0 %v714_v28, %s1316_s18 }
 0x34e   : > { %v716_v29 = vpop.f32.mrf.mxu2 }
 0x34f   : > { %v657_v30 = vpop.f32.mrf.mxu1 }
 0x350   : > { %723 = vrot.lane.b32.xlu2 %v657_v30, %s1317_s17 }
 0x357   : > { %v659_v31 = vpop.f32.mrf.mxu1 }
 0x3a9   : > { %v720_v34 = vpop.permute.xlu0 %719 }
 0x3aa   : > { %v730_v35 = vsel %vm490_vm1, %v543_v24, %v720_v34  ;;  %v724_v36 = vpop.permute.xlu2 %723 }
 0x3ab   : > { %v732_v37 = vsel %vm731_vm4, %v730_v35, %v724_v36 }
 0x3b9   : > { %v728_v38 = vpop.permute.xlu0 %727 }
 0x3ba   : > { %v734_v39 = vsel %vm733_vm5, %v732_v37, %v728_v38 }
 0x3bb   : > { %v735_v40 = vpack.c.bf16 %v734_v39, %v734_v39 }
 0x3bd   : > { %1063 = vmatmul.msk.bf16.vlgmr.msra.gmra.mxu0 %vm459_vm0, %v735_v40 }
 0x43a   : > { %v764_v41 = vpop.f32.mrf.mxu0 }
 0x43b   : > { %v768_v42 = vadd.f32 %v764_v41, %v1456_v2  ;;  %v1099_v2 = vld [vmem:[#allocation2 + $0x8] sm:$0xff]  ;;  %v1178_v41 = vld [vmem:[%s1601_s10] ss:$0 sm:$0xff] }
 0x43c   : > { %838 = vmatpush.bf16.msra.mxu1 %v1099_v2 }
 0x43d   : > { %v771_v43 = vsel %vm459_vm0, %v768_v42, 0.0 }
 0x43e   : > { %772 = vadd.xlane.f32.xlu2 %v771_v43 }
 0x440   : > { %839 = vmatpush.bf16.msra.mxu1 %v1098_v57 }
 0x442   : > { %v766_v44 = vpop.f32.mrf.mxu0 }
 0x443   : > { %v1179_v44 = vld [vmem:[%s1602_s11] ss:$0 sm:$0xff] }
 0x4b1   : > { %v773_v52 = vpop.xlane.xlu2 %772 }
 0x4b2   : > { %v781_v53 = vmul.f32 %v780_v51, %v773_v52 }
 0x4b4   : > { %v782_v54 = vsub.f32 %v768_v42, %v781_v53 }
 0x4b6   : > { %v783_v55 = vmul.f32 %v782_v54, %v782_v54 }
 0x4b8   : > { %v784_v56 = vsel %vm459_vm0, %v783_v55, 0.0 }
 0x4b9   : > { %785 = vadd.xlane.f32.xlu0 %v784_v56 }
 0x52c   : > { %v786_v59 = vpop.xlane.xlu0 %785 }
 0x52d   : > { %v787_v60 = vmul.f32 %v786_v59, %v780_v51 }
 0x52f   : > { %v788_v62 = vadd.f32 1e-05, %v787_v60 }
 0x531   : > { %1198 = vrsqrt.f32 %v788_v62  ;;  %vm795_vm8 = vweird.f32 %v788_v62 }
 0x537   : > { %v1199_v0 = vpop.eup %1198 }
 0x538   : > { %v790_v1 = vmul.f32 %v1199_v0, %v788_v62  ;;  %vm796_vm7 = vweird.f32 %v1199_v0 }
 0x539   : > { %vm797_vm9 = vmor %vm795_vm8, %vm796_vm7 }
 0x53a   : > { %v791_v3 = vmul.f32 %v1199_v0, %v790_v1 }
 0x53c   : > { %v792_v4 = vmul.f32 0.5, %v791_v3 }
 0x53e   : > { %v793_v5 = vsub.f32 1.5, %v792_v4 }
 0x540   : > { %v794_v6 = vmul.f32 %v1199_v0, %v793_v5 }
 0x542   : > { %v798_v9 = vsel %vm797_vm9, %v1199_v0, %v794_v6 }
 0x543   : > { %v799_v11 = vmul.f32 %v798_v9, %v782_v54 }
 0x545   : > { %v803_v12 = vmul.f32 %v1174_v8, %v799_v11 }
 0x547   : > { %v807_v13 = vadd.f32 %v1175_v10, %v803_v12 }
 0x549   : > { %v808_v7 = vpack.c.bf16 %v807_v13, %v807_v13 }
 0x54b   : > { %1072 = vmatmul.msk.bf16.vlgmr.msra.gmra.mxu1 %vm459_vm0, %v808_v7 }
 0x5c8   : > { %v841_v16 = vpop.f32.mrf.mxu1 }
 0x5c9   : > { %v842_v17 = vadd.f32 %v1176_v15, %v841_v16 }
 0x5cb   : > { %v845_v18 = vmax.f32 %v842_v17, 0.0 }
 0x5cd   : > { %v846_v19 = vpack.c.bf16 %v845_v18, %v845_v18 }
 0x5cf   : > { %1089 = vmatmul.msk.bf16.vlgmr.msra.gmra.mxu3 %vm883_vm10, %v846_v19 }
 0x5d0   : > { %v843_v20 = vpop.f32.mrf.mxu1 }
 0x652   : > { %v896_v22 = vpop.f32.mrf.mxu3 }
 0x653   : > { %v897_v23 = vadd.f32 %v1177_v21, %v896_v22 }
 0x655   : > { %v900_v24 = vadd.f32 %v897_v23, %v807_v13 }
 0x657   : > { %v903_v25 = vsel %vm459_vm0, %v900_v24, 0.0 }
 0x658   : > { %904 = vadd.xlane.f32.xlu1 %v903_v25 }
 0x65a   : > { %v898_v26 = vpop.f32.mrf.mxu3 }
 0x6cb   : > { %v905_v27 = vpop.xlane.xlu1 %904 }
 0x6cc   : > { %v906_v28 = vmul.f32 %v905_v27, %v780_v51 }
 0x6ce   : > { %v907_v29 = vsub.f32 %v900_v24, %v906_v28 }
 0x6d0   : > { %v908_v30 = vmul.f32 %v907_v29, %v907_v29 }
 0x6d2   : > { %v909_v31 = vsel %vm459_vm0, %v908_v30, 0.0 }
 0x6d3   : > { %910 = vadd.xlane.f32.xlu2 %v909_v31 }
 0x746   : > { %v911_v32 = vpop.xlane.xlu2 %910 }
 0x747   : > { %v912_v33 = vmul.f32 %v911_v32, %v780_v51 }
 0x749   : > { %v913_v34 = vadd.f32 1e-05, %v912_v33 }
 0x74b   : > { %1200 = vrsqrt.f32 %v913_v34  ;;  %vm920_vm12 = vweird.f32 %v913_v34 }
 0x751   : > { %v1201_v35 = vpop.eup %1200 }
 0x752   : > { %v915_v36 = vmul.f32 %v1201_v35, %v913_v34  ;;  %vm921_vm11 = vweird.f32 %v1201_v35 }
 0x753   : > { %vm922_vm13 = vmor %vm920_vm12, %vm921_vm11 }
 0x754   : > { %v916_v37 = vmul.f32 %v1201_v35, %v915_v36 }
 0x756   : > { %v917_v38 = vmul.f32 0.5, %v916_v37 }
 0x758   : > { %v918_v39 = vsub.f32 1.5, %v917_v38 }
 0x75a   : > { %v919_v40 = vmul.f32 %v1201_v35, %v918_v39 }
 0x75c   : > { %v923_v42 = vsel %vm922_vm13, %v1201_v35, %v919_v40 }
 0x75d   : > { %v924_v43 = vmul.f32 %v923_v42, %v907_v29 }
 0x75f   : > { %v928_v45 = vmul.f32 %v1178_v41, %v924_v43 }
 0x761   : > { %v932_v46 = vadd.f32 %v1179_v44, %v928_v45 }
 0x763   : > { %933 = vst.msk [vmem:[%s432_s0] sm:$0xff] %vm459_vm0, %v932_v46 }
 0x764   : > { %1259 = shalt.err (!%p1256_p8)
}
 0x765   : > { %1108 = dma.vmem_to_hbm [thread:$0]  (%p1422_p5), %s948_s25, 128, %s950_s1, %s935_s28  }
 0x766 PF: > { %p1120_p9 = scmp.ge.s32.totalorder %s1298_s24, 2  ;;  %s961_s0 = sand.u32 1, %s1286_s21  }
 0x767   : > { %s962_s19 = scalar_lea.sflag [#allocation4], %s961_s0 }
 0x768   : > { %p1115_p10 = pnand %p1120_p9, %p1426_p6 }
 0x76a   : > { %p1116_p11 = pneg %p1115_p10 }
 0x76c   : > { %1281 = dma.done.wait (%p1116_p11), %s962_s19, 128  }
 0x76d   : > { %1283 = vsyncadd (%p1116_p11), %s962_s19, 4294967168  ;;  %p23_p12 = scmp.ge.s32.totalorder %s1409_s27, 4   ;;  %s1614_s21 = smov %s1290_s22 }
 0x76e   : > { %s1615_s22 = smov %s1294_s23  ;;  %s1616_s23 = smov %s1420_s30 }
 0x76f   : > { %s1617_s24 = smov %s1409_s27  ;;  %25 = sbr.rel (!%p23_p12) target bundleno = 8 (0x8), region = 111 }
 0x774   :  { %968 = vsyncpa [#allocation3], 1 }
 0x775   :  { %970 = vsyncpa [#allocation3 + $0x1], 1 }
 0x776   :  { %971 = vsyncpa [#allocation4], 1 }
 0x777   :  { %973 = vsyncpa [#allocation4 + $0x1], 1 }

</bundles_post_ra>
